<compile_context>
chip_gen: v6e
topology: v6e:2x2x1
jax: 0.10.0
libtpu: 0.0.40
codegen_flags: <defaults>
</compile_context>

<pallas_src>
import jax
import jax.numpy as jnp
from jax import lax
from jax.experimental import pallas as pl
from jax.experimental.pallas import tpu as pltpu
import numpy as np


# ----------------------------------------------------------------------------
# Wrapper + kernel (kernel closes over the static geometry).
# ----------------------------------------------------------------------------
def duration_predictor_pallas(x_nct, mask_n1t, params):
    """x_nct: (B, Cin, T) f32; mask_n1t: (B, 1, T) f32.
    params: {'pslab': (Cf, K*Cin + K*Cf + 8) f32, 'kernel_size': K}."""
    B, Cin, T = x_nct.shape
    pslab = params["pslab"]
    K = int(params["kernel_size"])
    Cf, P = pslab.shape
    pad = K // 2
    W0 = T + 4 * pad            # per-element padded window width
    W2 = B * W0                 # conv-2 output width (all elements on lanes)
    W1 = W2 + (K - 1)           # conv-1 output width
    Wt = W2 + 2 * (K - 1)       # activation-slab width (tap slices in-bounds)

    # One activation slab: mask appended as channel row Cin, per-element
    # windows zero-padded by 2*pad in time and concatenated along lanes,
    # plus 2*(K-1) trailing zero lanes.
    xm = jnp.concatenate([x_nct, mask_n1t], axis=1)              # (B, Cin+1, T)
    xm = jnp.pad(xm, ((0, 0), (0, 0), (2 * pad, 2 * pad)))       # (B, Cin+1, W0)
    xm = jnp.transpose(xm, (1, 0, 2)).reshape(Cin + 1, W2)       # (Cin+1, B*W0)
    xm = jnp.pad(xm, ((0, 0), (0, 2 * (K - 1))))                 # (Cin+1, Wt)

    flops = 2 * (Cf * K * Cin * W1 + Cf * K * Cf * W2 + Cf * W2)
    cost = pl.CostEstimate(flops=flops, transcendentals=W1 + W2,
                           bytes_accessed=4 * (xm.size + pslab.size + W2))

    def dp_kernel(xm_ref, p_ref, out_ref):
        # Parameter slab layout: [ conv1 (Cf, K*Cin) | conv2 (Cf, K*Cf) | (Cf, 8) ]
        w1 = p_ref[:, 0:K * Cin]
        w2 = p_ref[:, K * Cin:K * (Cin + Cf)]
        pv = p_ref[:, K * (Cin + Cf):P]
        b1, g1, be1 = pv[:, 0:1], pv[:, 1:2], pv[:, 2:3]
        b2, g2, be2 = pv[:, 3:4], pv[:, 4:5], pv[:, 5:6]
        wp = pv[:, 6:7]
        bp = pv[0:1, 7:8]

        x = xm_ref[0:Cin, :]               # (Cin, Wt)
        m = xm_ref[Cin:Cin + 1, :]         # (1, Wt) mask slab (zero margins)

        def layer_norm_c(h, g, be):
            # One-pass stats over the channel (sublane) axis per time column.
            inv_n = jnp.float32(1.0 / h.shape[0])
            mean = jnp.sum(h, axis=0, keepdims=True) * inv_n
            msq = jnp.sum(h * h, axis=0, keepdims=True) * inv_n
            var = msq - mean * mean
            return (h - mean) * lax.rsqrt(var + 1e-5) * g + be

        def conv_im2col(xin, wmat, bias, wout):
            # K lane-shifted copies stacked on sublanes -> one MXU dot.
            xs = jnp.concatenate([xin[:, k:k + wout] for k in range(K)], axis=0)
            return jnp.dot(wmat, xs, preferred_element_type=jnp.float32) + bias

        # conv_1(x * mask) -> relu -> norm_1 -> (dropout = identity)
        h = conv_im2col(x * m, w1, b1, W1)                     # (Cf, W1)
        h = jnp.maximum(h, 0.0)
        h = layer_norm_c(h, g1, be1)

        # conv_2(h * mask) -> relu -> norm_2 -> (dropout = identity)
        m1 = m[:, pad:pad + W1]           # conv-2 input mask (pad + junk cols -> 0)
        h = conv_im2col(h * m1, w2, b2, W2)                    # (Cf, W2)
        h = jnp.maximum(h, 0.0)
        h = layer_norm_c(h, g2, be2)

        # proj(h * mask) * mask : 1x1 conv to 1 ch = VPU mul + sublane reduce.
        m2 = m[:, 2 * pad:2 * pad + W2]
        hm = h * m2
        out = jnp.sum(hm * wp, axis=0, keepdims=True) + bp     # (1, W2)
        out_ref[...] = (out * m2).astype(out_ref.dtype)

    out_row = pl.pallas_call(
        dp_kernel,
        out_shape=jax.ShapeDtypeStruct((1, W2), x_nct.dtype),
        grid_spec=pltpu.PrefetchScalarGridSpec(
            num_scalar_prefetch=0,
            grid=(1,),                                          # single shot
            in_specs=[
                pl.BlockSpec((Cin + 1, Wt), lambda i: (0, 0)),  # x + mask slab
                pl.BlockSpec((Cf, P), lambda i: (0, 0)),        # parameter slab
            ],
            out_specs=pl.BlockSpec((1, W2), lambda i: (0, 0)),
        ),
        compiler_params=pltpu.CompilerParams(
            dimension_semantics=("arbitrary",)),
        cost_estimate=cost,
    )(xm, pslab)

    # Each element's true outputs occupy offsets 0..T-1 of its W0-wide window.
    return out_row.reshape(B, W0)[:, :T].reshape(B, 1, T)


# ----------------------------------------------------------------------------
# Pure-JAX reference (mirrors the PyTorch forward, NCT layout).
# ----------------------------------------------------------------------------
def duration_predictor_ref(x, x_mask, torch_params):
    def conv1d(inp, w_oik, b, pad):
        out = lax.conv_general_dilated(
            inp, w_oik, window_strides=(1,), padding=[(pad, pad)],
            dimension_numbers=("NCH", "OIH", "NCH"))
        return out + b[None, :, None]

    def lnorm(h, gamma, beta):
        mean = jnp.mean(h, axis=1, keepdims=True)
        var = jnp.mean(jnp.square(h - mean), axis=1, keepdims=True)
        hn = (h - mean) / jnp.sqrt(var + 1e-5)
        return hn * gamma[None, :, None] + beta[None, :, None]

    K = torch_params["w1"].shape[2]
    pad = K // 2
    h = conv1d(x * x_mask, torch_params["w1"], torch_params["b1"], pad)
    h = jnp.maximum(h, 0.0)
    h = lnorm(h, torch_params["g1"], torch_params["be1"])
    h = conv1d(h * x_mask, torch_params["w2"], torch_params["b2"], pad)
    h = jnp.maximum(h, 0.0)
    h = lnorm(h, torch_params["g2"], torch_params["be2"])
    h = conv1d(h * x_mask, torch_params["wp"], torch_params["bp"], 0)
    return h * x_mask


# ----------------------------------------------------------------------------
# Main: deterministic params/inputs, run, check, print KERNEL_OK.
# ----------------------------------------------------------------------------
if __name__ == "__main__":
    # Module hyperparameters (gin_channels=0 -> no cond path)
    B, T = 2, 16
    in_channels, filter_channels, kernel_size = 8, 16, 3
    p_dropout = 0.5  # identity at inference

    key = jax.random.PRNGKey(0)
    ks = jax.random.split(key, 10)

    # PyTorch-format parameters (Conv1d weight: (C_out, C_in, K))
    w1 = jax.random.normal(ks[0], (filter_channels, in_channels, kernel_size),
                           jnp.float32) * 0.1
    b1 = jax.random.normal(ks[1], (filter_channels,), jnp.float32) * 0.1
    g1 = 1.0 + 0.1 * jax.random.normal(ks[2], (filter_channels,), jnp.float32)
    be1 = 0.1 * jax.random.normal(ks[3], (filter_channels,), jnp.float32)
    w2 = jax.random.normal(ks[4], (filter_channels, filter_channels, kernel_size),
                           jnp.float32) * 0.1
    b2 = jax.random.normal(ks[5], (filter_channels,), jnp.float32) * 0.1
    g2 = 1.0 + 0.1 * jax.random.normal(ks[6], (filter_channels,), jnp.float32)
    be2 = 0.1 * jax.random.normal(ks[7], (filter_channels,), jnp.float32)
    wp = jax.random.normal(ks[8], (1, filter_channels, 1), jnp.float32) * 0.1
    bp = jax.random.normal(ks[9], (1,), jnp.float32) * 0.1

    torch_params = dict(w1=w1, b1=b1, g1=g1, be1=be1,
                        w2=w2, b2=b2, g2=g2, be2=be2, wp=wp, bp=bp)

    # Kernel-format parameters: ONE slab.
    #  - im2col weights: (Cout, Cin, K) -> (Cout, K, Cin) -> (Cout, K*Cin)
    #    (row index k*Cin + i matches the kernel's sublane-stacked taps)
    #  - 8 small vectors packed as (Cf, 8): b1,g1,be1,b2,g2,be2,wp,bp-bcast
    w1_im2col = jnp.transpose(w1, (0, 2, 1)).reshape(
        filter_channels, kernel_size * in_channels)
    w2_im2col = jnp.transpose(w2, (0, 2, 1)).reshape(
        filter_channels, kernel_size * filter_channels)
    pvec = jnp.stack(
        [b1, g1, be1, b2, g2, be2, wp[0, :, 0],
         jnp.full((filter_channels,), bp[0], jnp.float32)], axis=1)
    kernel_params = dict(
        pslab=jnp.concatenate([w1_im2col, w2_im2col, pvec], axis=1),
        kernel_size=kernel_size,
    )

    # Inputs (PyTorch NCT convention), mask zeroes out the tail of seq 1
    kx, _ = jax.random.split(jax.random.PRNGKey(1))
    x = jax.random.normal(kx, (B, in_channels, T), jnp.float32)
    lengths = jnp.array([T, T - 4])
    x_mask = (jnp.arange(T)[None, None, :] < lengths[:, None, None]).astype(jnp.float32)

    out = duration_predictor_pallas(x, x_mask, kernel_params)
    out = jax.block_until_ready(out)

    ref = duration_predictor_ref(x, x_mask, torch_params)
    ref = jax.block_until_ready(ref)

    np.testing.assert_allclose(np.asarray(out), np.asarray(ref),
                               rtol=1e-4, atol=1e-4)
    print("KERNEL_OK")
</pallas_src>

<mosaic_0001>
module attributes {stable_mosaic.version = 11 : i64} {
  func.func @dp_kernel(%arg0: i32, %arg1: memref<9x44xf32, #tpu.memory_space<vmem>>, %arg2: memref<16x80xf32, #tpu.memory_space<vmem>>, %arg3: memref<1x40xf32, #tpu.memory_space<vmem>>) attributes {dimension_semantics = [#tpu.dimension_semantics<arbitrary>], iteration_bounds = array<i64: 1>, scalar_prefetch = 0 : i64, scratch_operands = 0 : i64, tpu.core_type = #tpu.core_type<tc>, window_params = [{pipeline_mode = #tpu.pipeline_mode<synchronous>, transform_indices = @transform_0, window_bounds = array<i64: 9, 44>}, {pipeline_mode = #tpu.pipeline_mode<synchronous>, transform_indices = @transform_1, window_bounds = array<i64: 16, 80>}, {pipeline_mode = #tpu.pipeline_mode<synchronous>, transform_indices = @transform_2, window_bounds = array<i64: 1, 40>}]} {
    %c0 = arith.constant 0 : index
    %c0_0 = arith.constant 0 : index
    %0 = vector.load %arg2[%c0, %c0_0] : memref<16x80xf32, #tpu.memory_space<vmem>>, vector<16x24xf32>
    %c0_1 = arith.constant 0 : index
    %c24 = arith.constant 24 : index
    %1 = vector.load %arg2[%c0_1, %c24] : memref<16x80xf32, #tpu.memory_space<vmem>>, vector<16x48xf32>
    %c0_2 = arith.constant 0 : index
    %c72 = arith.constant 72 : index
    %2 = vector.load %arg2[%c0_2, %c72] : memref<16x80xf32, #tpu.memory_space<vmem>>, vector<16x8xf32>
    %3 = vector.extract_strided_slice %2 {offsets = [0, 0], sizes = [16, 1], strides = [1, 1]} : vector<16x8xf32> to vector<16x1xf32>
    %4 = vector.extract_strided_slice %2 {offsets = [0, 1], sizes = [16, 1], strides = [1, 1]} : vector<16x8xf32> to vector<16x1xf32>
    %5 = vector.extract_strided_slice %2 {offsets = [0, 2], sizes = [16, 1], strides = [1, 1]} : vector<16x8xf32> to vector<16x1xf32>
    %6 = vector.extract_strided_slice %2 {offsets = [0, 3], sizes = [16, 1], strides = [1, 1]} : vector<16x8xf32> to vector<16x1xf32>
    %7 = vector.extract_strided_slice %2 {offsets = [0, 4], sizes = [16, 1], strides = [1, 1]} : vector<16x8xf32> to vector<16x1xf32>
    %8 = vector.extract_strided_slice %2 {offsets = [0, 5], sizes = [16, 1], strides = [1, 1]} : vector<16x8xf32> to vector<16x1xf32>
    %9 = vector.extract_strided_slice %2 {offsets = [0, 6], sizes = [16, 1], strides = [1, 1]} : vector<16x8xf32> to vector<16x1xf32>
    %10 = vector.extract_strided_slice %2 {offsets = [0, 7], sizes = [1, 1], strides = [1, 1]} : vector<16x8xf32> to vector<1x1xf32>
    %c0_3 = arith.constant 0 : index
    %c0_4 = arith.constant 0 : index
    %11 = vector.load %arg1[%c0_3, %c0_4] : memref<9x44xf32, #tpu.memory_space<vmem>>, vector<8x44xf32>
    %c8 = arith.constant 8 : index
    %c0_5 = arith.constant 0 : index
    %12 = vector.load %arg1[%c8, %c0_5] : memref<9x44xf32, #tpu.memory_space<vmem>>, vector<1x44xf32>
    %13 = vector.broadcast %12 : vector<1x44xf32> to vector<8x44xf32>
    %14 = arith.mulf %11, %13 : vector<8x44xf32>
    %15 = vector.extract_strided_slice %14 {offsets = [0, 0], sizes = [8, 42], strides = [1, 1]} : vector<8x44xf32> to vector<8x42xf32>
    %16 = vector.extract_strided_slice %14 {offsets = [0, 1], sizes = [8, 42], strides = [1, 1]} : vector<8x44xf32> to vector<8x42xf32>
    %17 = vector.extract_strided_slice %14 {offsets = [0, 2], sizes = [8, 42], strides = [1, 1]} : vector<8x44xf32> to vector<8x42xf32>
    %18 = tpu.concatenate %15, %16, %17 in 0 : vector<8x42xf32>, vector<8x42xf32>, vector<8x42xf32> -> vector<24x42xf32>
    %cst = arith.constant dense<0.000000e+00> : vector<16x42xf32>
    %19 = tpu.matmul %0, %18, %cst {dimension_numbers = #tpu.dot_dimension_numbers<[1], [0], [0], [1], [0, 0, 1, 1], [], []>} : vector<16x24xf32>, vector<24x42xf32>, vector<16x42xf32> -> vector<16x42xf32>
    %20 = vector.broadcast %3 : vector<16x1xf32> to vector<16x42xf32>
    %21 = arith.addf %19, %20 : vector<16x42xf32>
    %cst_6 = arith.constant 0.000000e+00 : f32
    %22 = vector.broadcast %cst_6 : f32 to vector<16x42xf32>
    %23 = arith.maximumf %21, %22 : vector<16x42xf32>
    %cst_7 = arith.constant dense<0.000000e+00> : vector<42xf32>
    %24 = vector.multi_reduction <add>, %23, %cst_7 [0] : vector<16x42xf32> to vector<42xf32>
    %25 = vector.shape_cast %24 : vector<42xf32> to vector<1x42xf32>
    %cst_8 = arith.constant 6.250000e-02 : f32
    %26 = vector.broadcast %cst_8 : f32 to vector<1x42xf32>
    %27 = arith.mulf %25, %26 : vector<1x42xf32>
    %28 = arith.mulf %23, %23 : vector<16x42xf32>
    %cst_9 = arith.constant dense<0.000000e+00> : vector<42xf32>
    %29 = vector.multi_reduction <add>, %28, %cst_9 [0] : vector<16x42xf32> to vector<42xf32>
    %30 = vector.shape_cast %29 : vector<42xf32> to vector<1x42xf32>
    %cst_10 = arith.constant 6.250000e-02 : f32
    %31 = vector.broadcast %cst_10 : f32 to vector<1x42xf32>
    %32 = arith.mulf %30, %31 : vector<1x42xf32>
    %33 = arith.mulf %27, %27 : vector<1x42xf32>
    %34 = arith.subf %32, %33 : vector<1x42xf32>
    %35 = vector.broadcast %27 : vector<1x42xf32> to vector<16x42xf32>
    %36 = arith.subf %23, %35 : vector<16x42xf32>
    %cst_11 = arith.constant 9.99999974E-6 : f32
    %37 = vector.broadcast %cst_11 : f32 to vector<1x42xf32>
    %38 = arith.addf %34, %37 : vector<1x42xf32>
    %39 = math.rsqrt %38 : vector<1x42xf32>
    %40 = vector.broadcast %39 : vector<1x42xf32> to vector<16x42xf32>
    %41 = arith.mulf %36, %40 : vector<16x42xf32>
    %42 = vector.broadcast %4 : vector<16x1xf32> to vector<16x42xf32>
    %43 = arith.mulf %41, %42 : vector<16x42xf32>
    %44 = vector.broadcast %5 : vector<16x1xf32> to vector<16x42xf32>
    %45 = arith.addf %43, %44 : vector<16x42xf32>
    %46 = vector.extract_strided_slice %12 {offsets = [0, 1], sizes = [1, 42], strides = [1, 1]} : vector<1x44xf32> to vector<1x42xf32>
    %47 = vector.broadcast %46 : vector<1x42xf32> to vector<16x42xf32>
    %48 = arith.mulf %45, %47 : vector<16x42xf32>
    %49 = vector.extract_strided_slice %48 {offsets = [0, 0], sizes = [16, 40], strides = [1, 1]} : vector<16x42xf32> to vector<16x40xf32>
    %50 = vector.extract_strided_slice %48 {offsets = [0, 1], sizes = [16, 40], strides = [1, 1]} : vector<16x42xf32> to vector<16x40xf32>
    %51 = vector.extract_strided_slice %48 {offsets = [0, 2], sizes = [16, 40], strides = [1, 1]} : vector<16x42xf32> to vector<16x40xf32>
    %52 = tpu.concatenate %49, %50, %51 in 0 : vector<16x40xf32>, vector<16x40xf32>, vector<16x40xf32> -> vector<48x40xf32>
    %cst_12 = arith.constant dense<0.000000e+00> : vector<16x40xf32>
    %53 = tpu.matmul %1, %52, %cst_12 {dimension_numbers = #tpu.dot_dimension_numbers<[1], [0], [0], [1], [0, 0, 1, 1], [], []>} : vector<16x48xf32>, vector<48x40xf32>, vector<16x40xf32> -> vector<16x40xf32>
    %54 = vector.broadcast %6 : vector<16x1xf32> to vector<16x40xf32>
    %55 = arith.addf %53, %54 : vector<16x40xf32>
    %cst_13 = arith.constant 0.000000e+00 : f32
    %56 = vector.broadcast %cst_13 : f32 to vector<16x40xf32>
    %57 = arith.maximumf %55, %56 : vector<16x40xf32>
    %cst_14 = arith.constant dense<0.000000e+00> : vector<40xf32>
    %58 = vector.multi_reduction <add>, %57, %cst_14 [0] : vector<16x40xf32> to vector<40xf32>
    %59 = vector.shape_cast %58 : vector<40xf32> to vector<1x40xf32>
    %cst_15 = arith.constant 6.250000e-02 : f32
    %60 = vector.broadcast %cst_15 : f32 to vector<1x40xf32>
    %61 = arith.mulf %59, %60 : vector<1x40xf32>
    %62 = arith.mulf %57, %57 : vector<16x40xf32>
    %cst_16 = arith.constant dense<0.000000e+00> : vector<40xf32>
    %63 = vector.multi_reduction <add>, %62, %cst_16 [0] : vector<16x40xf32> to vector<40xf32>
    %64 = vector.shape_cast %63 : vector<40xf32> to vector<1x40xf32>
    %cst_17 = arith.constant 6.250000e-02 : f32
    %65 = vector.broadcast %cst_17 : f32 to vector<1x40xf32>
    %66 = arith.mulf %64, %65 : vector<1x40xf32>
    %67 = arith.mulf %61, %61 : vector<1x40xf32>
    %68 = arith.subf %66, %67 : vector<1x40xf32>
    %69 = vector.broadcast %61 : vector<1x40xf32> to vector<16x40xf32>
    %70 = arith.subf %57, %69 : vector<16x40xf32>
    %cst_18 = arith.constant 9.99999974E-6 : f32
    %71 = vector.broadcast %cst_18 : f32 to vector<1x40xf32>
    %72 = arith.addf %68, %71 : vector<1x40xf32>
    %73 = math.rsqrt %72 : vector<1x40xf32>
    %74 = vector.broadcast %73 : vector<1x40xf32> to vector<16x40xf32>
    %75 = arith.mulf %70, %74 : vector<16x40xf32>
    %76 = vector.broadcast %7 : vector<16x1xf32> to vector<16x40xf32>
    %77 = arith.mulf %75, %76 : vector<16x40xf32>
    %78 = vector.broadcast %8 : vector<16x1xf32> to vector<16x40xf32>
    %79 = arith.addf %77, %78 : vector<16x40xf32>
    %80 = vector.extract_strided_slice %12 {offsets = [0, 2], sizes = [1, 40], strides = [1, 1]} : vector<1x44xf32> to vector<1x40xf32>
    %81 = vector.broadcast %80 : vector<1x40xf32> to vector<16x40xf32>
    %82 = arith.mulf %79, %81 : vector<16x40xf32>
    %83 = vector.broadcast %9 : vector<16x1xf32> to vector<16x40xf32>
    %84 = arith.mulf %82, %83 : vector<16x40xf32>
    %cst_19 = arith.constant dense<0.000000e+00> : vector<40xf32>
    %85 = vector.multi_reduction <add>, %84, %cst_19 [0] : vector<16x40xf32> to vector<40xf32>
    %86 = vector.shape_cast %85 : vector<40xf32> to vector<1x40xf32>
    %87 = vector.broadcast %10 : vector<1x1xf32> to vector<1x40xf32>
    %88 = arith.addf %86, %87 : vector<1x40xf32>
    %89 = arith.mulf %88, %80 : vector<1x40xf32>
    %c0_20 = arith.constant 0 : index
    %c0_21 = arith.constant 0 : index
    %90 = vector.load %arg3[%c0_20, %c0_21] : memref<1x40xf32, #tpu.memory_space<vmem>>, vector<1x40xf32>
    tpu.vector_store %arg3[%c0_20, %c0_21], %89 {strides = array<i32>} : memref<1x40xf32, #tpu.memory_space<vmem>>, vector<1x40xf32>,
    return
  }
  func.func @transform_0(%arg0: i32) -> (i32, i32) {
    %c0_i32 = arith.constant 0 : i32
    %c0_i32_0 = arith.constant 0 : i32
    %c0_i32_1 = arith.constant 0 : i32
    return %c0_i32, %c0_i32_0 : i32, i32
  }
  func.func @transform_1(%arg0: i32) -> (i32, i32) {
    %c0_i32 = arith.constant 0 : i32
    %c0_i32_0 = arith.constant 0 : i32
    %c0_i32_1 = arith.constant 0 : i32
    return %c0_i32, %c0_i32_0 : i32, i32
  }
  func.func @transform_2(%arg0: i32) -> (i32, i32) {
    %c0_i32 = arith.constant 0 : i32
    %c0_i32_0 = arith.constant 0 : i32
    %c0_i32_1 = arith.constant 0 : i32
    return %c0_i32, %c0_i32_0 : i32, i32
  }
}

</mosaic_0001>

<bundles_post_ra>
// kernel: tpu_custom_call.1
= control target key start
LH: loop header
LB: loop body
LE: loop exit
PB: predicated region body
PF: predicated region fallthrough
CT: control target
= control target key end

     0   :  { %7 = vsyncpa [#allocation3], 0  ;;  %s646_s0 = inlined_call_operand.hbm [shape: f32[9,44], index: 0, kind: input, shape index: {}]   ;;  %s647_s1 = inlined_call_operand.hbm [shape: f32[16,80], index: 1, kind: input, shape index: {}]   ;;  %s648_s2 = inlined_call_operand.hbm [shape: f32[1,40], index: 2, kind: output, shape index: {}]  }
   0x1   :  { %8 = vsyncpa [#allocation6], 0 }
   0x2   :  { %9 = vsyncpa [#allocation4], 0  ;;  %s557_s9 = smov [#allocation2]  }
   0x3   :  { %s15_s10 = sshll.u32 %s557_s9, 4  ;;  %s16_s10 = int_to_ptr.vmem [resolvable:$true] %s15_s10 }
   0x4   :  { %s499_s11 = scalar_lea.vmem %s16_s10, 256  ;;  %p504_p1 = scmp.lt.s32.totalorder %s16_s10, %s16_s10 }
   0x5   :  { %p500_p0 = scmp.ne.s32.totalorder %s16_s10, %s499_s11  ;;  %p505_p2 = scmp.lt.s32.totalorder %s499_s11, %s499_s11 }
   0x7   :  { %p506_p3 = por %p505_p2, %p504_p1 }
   0x9   :  { %p507_p4 = pnand %p506_p3, %p500_p0 }
   0xb   :  { %510 = shalt.err (!%p507_p4)
}
   0xc   :  { %s558_s12 = smov 128   ;;  %s559_s13 = smov 8  }
   0xd   :  { %21 = dma.hbm_to_vmem [thread:$0]  %s646_s0, 256, %s16_s10, [#allocation3], %s558_s12, %s558_s12, %s559_s13  }
   0xe   :  { %s560_s16 = smov [#allocation5]  }
   0xf   :  { %s27_s17 = sshll.u32 %s560_s16, 4  ;;  %s28_s17 = int_to_ptr.vmem [resolvable:$true] %s27_s17 }
  0x10   :  { %s519_s18 = scalar_lea.vmem %s28_s17, 256  ;;  %p524_p6 = scmp.lt.s32.totalorder %s28_s17, %s28_s17 }
  0x11   :  { %p520_p5 = scmp.ne.s32.totalorder %s28_s17, %s519_s18  ;;  %p525_p7 = scmp.lt.s32.totalorder %s519_s18, %s519_s18 }
  0x13   :  { %p526_p8 = por %p525_p7, %p524_p6 }
  0x15   :  { %p527_p9 = pnand %p526_p8, %p520_p5 }
  0x17   :  { %530 = shalt.err (!%p527_p9)
}
  0x18   :  { %33 = dma.hbm_to_vmem [thread:$0]  %s647_s1, 256, %s28_s17, [#allocation6], %s558_s12, %s558_s12, %s559_s13  }
  0x19   :  { %551 = dma.done.wait [#allocation3], 256  }
  0x1a   :  { %552 = vsyncadd [#allocation3], 4294967040 }
  0x1b   :  { %553 = dma.done.wait [#allocation6], 256  }
  0x1c   :  { %554 = vsyncadd [#allocation6], 4294967040  ;;  %v44_v0 = vlaneseq  ;;  %vm66_vm0 = vcmask 195584   ;;  %v42_v3 = vld [vmem:[#allocation2] sm:$0xff]  ;;  %v594_v4 = vld [vmem:[#allocation2 + $0x8] sm:$0x1] }
  0x1d   :  { %v596_v5 = vld [vmem:[#allocation5] sm:$0xff]  ;;  %v561_v7 = vmov 72   ;;  %v562_v8 = vmov 73   ;;  %s563_s0 = smov 126   ;;  %v606_v10 = vld [vmem:[#allocation5 + $0x8] sm:$0xff]  ;;  %s564_s1 = smov 127  }
  0x1e   :  { %v45_v1 = vshrl.u32 %v44_v0, 7  ;;  %439 = vmatprep.mubr.msk.f32.mxu0 %vm66_vm0, %v596_v5  ;;  %473 = vset.pattern.permute.xlu1 %v561_v7  ;;  %v565_v11 = vmov 74   ;;  %vm148_vm1 = vcmask 343040   ;;  %v566_v63 = vmov 75   ;;  %s567_s21 = smov 104   ;;  %s572_s22 = smov [#allocation7]  }
  0x1f   :  { %58 = vperm.xlu1 %473, %v596_v5   ;;  %474 = vset.pattern.permute.xlu0 %v562_v8  ;;  %v568_v0 = vmov 76   ;;  %vm231_vm2 = vcmask 392192   ;;  %vm313_vm3 = vcmask 326656   ;;  %s406_s23 = sshll.u32 %s572_s22, 4  ;;  %vm398_vm4 = vcmask 319488   ;;  %s407_s23 = int_to_ptr.vmem [resolvable:$true] %s406_s23 }
  0x20   :  { %v46_v2 = vsub.s32 0, %v45_v1  ;;  %v569_v1 = vmov 77   ;;  %s531_s24 = scalar_lea.vmem %s407_s23, 16  ;;  %s535_s25 = scalar_lea.vmem %s407_s23, 32 }
  0x21   :  { %p532_p10 = scmp.ne.s32.totalorder %s407_s23, %s531_s24  ;;  %p536_p11 = scmp.lt.s32.totalorder %s407_s23, %s407_s23 }
  0x22   :  { %v599_v6 = vrot.slane %v594_v4, %v46_v2  ;;  %v570_v2 = vmov 78   ;;  %p537_p12 = scmp.lt.s32.totalorder %s535_s25, %s531_s24 }
  0x23   :  { %63 = vperm.xlu1 %473, %v606_v10  }
  0x24   :  { %v48_v9 = vmul.f32 %v599_v6, %v42_v3  ;;  %v571_v3 = vmov 79   ;;  %p538_p13 = por %p537_p12, %p536_p11 }
  0x26   :  { %53 = vrot.lane.b32.xlu0 %v48_v9, %s563_s0  ;;  %p539_p0 = pnand %p538_p13, %p532_p10 }
  0x27   :  { %475 = vset.pattern.permute.xlu1 %v562_v8 }
  0x28   :  { %180 = vperm.xlu1 %475, %v596_v5  }
  0x2a   :  { %50 = vrot.lane.b32.xlu0 %v48_v9, %s564_s1 }
  0x2c   :  { %476 = vset.pattern.permute.xlu1 %v565_v11 }
  0x2d   :  { %194 = vperm.xlu1 %476, %v606_v10  }
  0x2e   :  { %184 = vperm.xlu0 %474, %v606_v10  }
  0x31   :  { %200 = vrot.lane.b32.xlu1 %v599_v6, %s564_s1 }
  0x32   :  { %477 = vset.pattern.permute.xlu0 %v565_v11  ;;  %478 = vset.pattern.permute.xlu1 %v566_v63 }
  0x33   :  { %190 = vperm.xlu0 %477, %v596_v5  }
  0x37   :  { %479 = vset.pattern.permute.xlu0 %v566_v63 }
  0x98   :  { %v54_v12 = vpop.permute.xlu0 %53 }
  0x99   :  { %433 = vmatprep.subr.mxu0 %v54_v12 }
  0x9a   :  { %434 = vmatpush3.msra.mxu0 %v54_v12  ;;  %v59_v14 = vpop.permute.xlu1 %58 }
  0x9c   :  { %v51_v13 = vpop.permute.xlu0 %50 }
  0x9d   :  { %435 = vmatprep.subr.mxu0 %v51_v13 }
  0x9e   :  { %436 = vmatpush3.msra.mxu0 %v51_v13  ;;  %v64_v15 = vpop.permute.xlu1 %63 }
  0x9f   :  { %437 = vmatprep.subr.mxu0 %v48_v9 }
  0xa0   :  { %438 = vmatpush3.msra.mxu0 %v48_v9 }
  0xa1   :  { %440 = vmatmul.mubr.msk.f32.vlgmr.msra.gmra.mxu0 %vm66_vm0, %v606_v10 }
  0xa3   :  { %v181_v47 = vpop.permute.xlu1 %180 }
  0xa8   :  { %v195_v49 = vpop.permute.xlu1 %194 }
  0xa9   :  { %v185_v48 = vpop.permute.xlu0 %184 }
  0xac   :  { %v201_v58 = vpop.permute.xlu1 %200 }
  0xae   :  { %v191_v55 = vpop.permute.xlu0 %190 }
 0x161   :  { %v441_v16 = vpop.f32.mrf.mxu0 }
 0x162   :  { %v143_v17 = vadd.f32 %v441_v16, %v64_v15 }
 0x163   :  { %v137_v18 = vpop.f32.mrf.mxu0 }
 0x164   :  { %v147_v19 = vmax.f32 %v143_v17, 0.0  ;;  %v138_v20 = vadd.f32 %v137_v18, %v59_v14 }
 0x166   :  { %v160_v21 = vmul.f32 %v147_v19, %v147_v19  ;;  %v146_v22 = vmax.f32 %v138_v20, 0.0  ;;  %v150_v23 = vsel %vm148_vm1, %v147_v19, 0.0 }
 0x168   :  { %v149_v24 = vsel %vm148_vm1, %v146_v22, 0.0  ;;  %v159_v25 = vmul.f32 %v146_v22, %v146_v22  ;;  %v162_v27 = vsel %vm148_vm1, %v160_v21, 0.0 }
 0x169   :  { %v151_v26 = vadd.f32 %v150_v23, %v149_v24 }
 0x16a   :  { %v161_v28 = vsel %vm148_vm1, %v159_v25, 0.0 }
 0x16b   :  { %v152_v29 = vrot.slane %v151_v26, 4  ;;  %v163_v30 = vadd.f32 %v162_v27, %v161_v28 }
 0x16d   :  { %v153_v31 = vadd.f32 %v152_v29, %v151_v26  ;;  %v164_v32 = vrot.slane %v163_v30, 4 }
 0x16f   :  { %v154_v33 = vrot.slane %v153_v31, 2  ;;  %v165_v34 = vadd.f32 %v164_v32, %v163_v30 }
 0x171   :  { %v155_v35 = vadd.f32 %v154_v33, %v153_v31  ;;  %v166_v36 = vrot.slane %v165_v34, 2 }
 0x173   :  { %v167_v37 = vadd.f32 %v166_v36, %v165_v34  ;;  %v156_v38 = vrot.slane %v155_v35, 1 }
 0x175   :  { %v168_v39 = vrot.slane %v167_v37, 1  ;;  %v157_v40 = vadd.f32 %v156_v38, %v155_v35 }
 0x177   :  { %v169_v41 = vadd.f32 %v168_v39, %v167_v37  ;;  %v158_v42 = vmul.f32 0.0625, %v157_v40 }
 0x179   :  { %v170_v43 = vmul.f32 0.0625, %v169_v41  ;;  %v171_v44 = vmul.f32 %v158_v42, %v158_v42  ;;  %v173_v50 = vsub.f32 %v146_v22, %v158_v42  ;;  %v174_v51 = vsub.f32 %v147_v19, %v158_v42 }
 0x17b   :  { %v172_v45 = vsub.f32 %v170_v43, %v171_v44 }
 0x17d   :  { %v175_v46 = vadd.f32 1e-05, %v172_v45 }
 0x17f   :  { %487 = vrsqrt.f32 %v175_v46 }
 0x18c   :  { %v488_v52 = vpop.eup %487 }
 0x18d   :  { %v177_v53 = vmul.f32 %v488_v52, %v173_v50  ;;  %v178_v54 = vmul.f32 %v488_v52, %v174_v51 }
 0x18f   :  { %v187_v56 = vmul.f32 %v181_v47, %v177_v53  ;;  %v188_v57 = vmul.f32 %v185_v48, %v178_v54 }
 0x191   :  { %v198_v59 = vadd.f32 %v195_v49, %v188_v57  ;;  %v197_v60 = vadd.f32 %v191_v55, %v187_v56 }
 0x193   :  { %v203_v61 = vmul.f32 %v201_v58, %v197_v60  ;;  %v204_v62 = vmul.f32 %v201_v58, %v198_v59 }
 0x195   :  { %215 = vrot.lane.b32.xlu1 %v204_v62, %s563_s0  ;;  %213 = vrot.lane.b32.xlu0 %v203_v61, %s563_s0 }
 0x199   :  { %209 = vrot.lane.b32.xlu1 %v204_v62, %s564_s1  ;;  %207 = vrot.lane.b32.xlu0 %v203_v61, %s564_s1 }
 0x19d   :  { %227 = vrot.lane.b32.xlu1 %v596_v5, %s567_s21  ;;  %229 = vrot.lane.b32.xlu0 %v606_v10, %s567_s21 }
 0x1a1   :  { %224 = vperm.xlu0 %479, %v606_v10   ;;  %220 = vperm.xlu1 %478, %v596_v5  }
 0x1a5   :  { %480 = vset.pattern.permute.xlu1 %v568_v0  ;;  %481 = vset.pattern.permute.xlu0 %v569_v1 }
 0x1a6   :  { %345 = vperm.xlu1 %480, %v596_v5   ;;  %355 = vperm.xlu0 %481, %v596_v5  }
 0x1aa   :  { %349 = vperm.xlu1 %480, %v606_v10   ;;  %484 = vset.pattern.permute.xlu0 %v570_v2 }
 0x1ab   :  { %374 = vperm.xlu0 %484, %v606_v10  }
 0x1ae   :  { %482 = vset.pattern.permute.xlu1 %v569_v1 }
 0x1af   :  { %359 = vperm.xlu1 %482, %v606_v10   ;;  %394 = vrot.lane.b32.xlu0 %v594_v4, %s563_s0 }
 0x1b0   :  { %486 = vset.pattern.permute.xlu0 %v571_v3 }
 0x1b3   :  { %483 = vset.pattern.permute.xlu1 %v570_v2 }
 0x1b4   :  { %370 = vperm.xlu1 %483, %v596_v5  }
 0x1b8   :  { %364 = vrot.lane.b32.xlu1 %v599_v6, %s563_s0 }
 0x1b9   :  { %485 = vset.pattern.permute.xlu1 %v571_v3 }
 0x1bc   :  { %389 = vperm.xlu1 %485, %v596_v5  }
 0x207   :  { %v216_v7 = vpop.permute.xlu1 %215  ;;  %v214_v8 = vpop.permute.xlu0 %213 }
 0x208   :  { %442 = vmatprep.subr.mxu1 %v216_v7 }
 0x209   :  { %443 = vmatpush3.msra.mxu1 %v216_v7 }
 0x20a   :  { %444 = vmatprep.subr.mxu1 %v214_v8 }
 0x20b   :  { %v210_v9 = vpop.permute.xlu1 %209  ;;  %445 = vmatpush3.msra.mxu1 %v214_v8  ;;  %v208_v4 = vpop.permute.xlu0 %207 }
 0x20c   :  { %446 = vmatprep.subr.mxu1 %v210_v9 }
 0x20d   :  { %447 = vmatpush3.msra.mxu1 %v210_v9 }
 0x20e   :  { %448 = vmatprep.subr.mxu1 %v208_v4 }
 0x20f   :  { %449 = vmatpush3.msra.mxu1 %v208_v4  ;;  %v228_v10 = vpop.permute.xlu1 %227  ;;  %v230_v6 = vpop.permute.xlu0 %229 }
 0x210   :  { %450 = vmatprep.subr.mxu1 %v204_v62  ;;  %454 = vmatprep.mubr.msk.f32.mxu1 %vm231_vm2, %v228_v10 }
 0x211   :  { %451 = vmatpush3.msra.mxu1 %v204_v62 }
 0x212   :  { %452 = vmatprep.subr.mxu1 %v203_v61 }
 0x213   :  { %453 = vmatpush3.msra.mxu1 %v203_v61 }
 0x214   :  { %455 = vmatmul.mubr.msk.f32.vlgmr.msra.gmra.mxu1 %vm231_vm2, %v230_v6 }
 0x21c   :  { %v225_v5 = vpop.permute.xlu0 %224  ;;  %v221_v12 = vpop.permute.xlu1 %220 }
 0x221   :  { %v346_v41 = vpop.permute.xlu1 %345  ;;  %v356_v50 = vpop.permute.xlu0 %355 }
 0x225   :  { %v350_v44 = vpop.permute.xlu1 %349 }
 0x226   :  { %v375_v58 = vpop.permute.xlu0 %374 }
 0x22a   :  { %v360_v45 = vpop.permute.xlu1 %359  ;;  %v395_v6 = vpop.permute.xlu0 %394 }
 0x22f   :  { %v371_v46 = vpop.permute.xlu1 %370 }
 0x233   :  { %v365_v55 = vpop.permute.xlu1 %364 }
 0x237   :  { %v390_v4 = vpop.permute.xlu1 %389 }
 0x2d4   :  { %v456_v11 = vpop.f32.mrf.mxu1 }
 0x2d5   :  { %v308_v13 = vadd.f32 %v456_v11, %v225_v5 }
 0x2d6   :  { %v302_v14 = vpop.f32.mrf.mxu1 }
 0x2d7   :  { %v312_v15 = vmax.f32 %v308_v13, 0.0  ;;  %v303_v16 = vadd.f32 %v302_v14, %v221_v12 }
 0x2d9   :  { %v325_v17 = vmul.f32 %v312_v15, %v312_v15  ;;  %v311_v18 = vmax.f32 %v303_v16, 0.0  ;;  %v315_v19 = vsel %vm313_vm3, %v312_v15, 0.0 }
 0x2db   :  { %v314_v20 = vsel %vm313_vm3, %v311_v18, 0.0  ;;  %v324_v21 = vmul.f32 %v311_v18, %v311_v18  ;;  %v327_v23 = vsel %vm313_vm3, %v325_v17, 0.0 }
 0x2dc   :  { %v316_v22 = vadd.f32 %v315_v19, %v314_v20 }
 0x2dd   :  { %v326_v24 = vsel %vm313_vm3, %v324_v21, 0.0 }
 0x2de   :  { %v317_v25 = vrot.slane %v316_v22, 4  ;;  %v328_v26 = vadd.f32 %v327_v23, %v326_v24 }
 0x2e0   :  { %v318_v27 = vadd.f32 %v317_v25, %v316_v22  ;;  %v329_v28 = vrot.slane %v328_v26, 4 }
 0x2e2   :  { %v319_v29 = vrot.slane %v318_v27, 2  ;;  %v330_v30 = vadd.f32 %v329_v28, %v328_v26 }
 0x2e4   :  { %v320_v31 = vadd.f32 %v319_v29, %v318_v27  ;;  %v331_v32 = vrot.slane %v330_v30, 2 }
 0x2e6   :  { %v332_v33 = vadd.f32 %v331_v32, %v330_v30  ;;  %v321_v34 = vrot.slane %v320_v31, 1 }
 0x2e8   :  { %v333_v35 = vrot.slane %v332_v33, 1  ;;  %v322_v36 = vadd.f32 %v321_v34, %v320_v31 }
 0x2ea   :  { %v334_v37 = vadd.f32 %v333_v35, %v332_v33  ;;  %v323_v38 = vmul.f32 0.0625, %v322_v36 }
 0x2ec   :  { %v335_v39 = vmul.f32 0.0625, %v334_v37  ;;  %v336_v40 = vmul.f32 %v323_v38, %v323_v38  ;;  %v338_v47 = vsub.f32 %v311_v18, %v323_v38  ;;  %v339_v48 = vsub.f32 %v312_v15, %v323_v38 }
 0x2ee   :  { %v337_v42 = vsub.f32 %v335_v39, %v336_v40 }
 0x2f0   :  { %v340_v43 = vadd.f32 1e-05, %v337_v42 }
 0x2f2   :  { %489 = vrsqrt.f32 %v340_v43 }
 0x2ff   :  { %v490_v49 = vpop.eup %489 }
 0x300   :  { %v342_v51 = vmul.f32 %v490_v49, %v338_v47  ;;  %v343_v52 = vmul.f32 %v490_v49, %v339_v48 }
 0x302   :  { %v352_v53 = vmul.f32 %v346_v41, %v342_v51  ;;  %v353_v54 = vmul.f32 %v350_v44, %v343_v52 }
 0x304   :  { %v363_v56 = vadd.f32 %v360_v45, %v353_v54  ;;  %v362_v57 = vadd.f32 %v356_v50, %v352_v53 }
 0x306   :  { %v367_v59 = vmul.f32 %v365_v55, %v362_v57  ;;  %v368_v60 = vmul.f32 %v365_v55, %v363_v56 }
 0x308   :  { %v377_v61 = vmul.f32 %v371_v46, %v367_v59  ;;  %v378_v62 = vmul.f32 %v375_v58, %v368_v60 }
 0x30a   :  { %v379_v63 = vsel %vm313_vm3, %v377_v61, 0.0  ;;  %v380_v0 = vsel %vm313_vm3, %v378_v62, 0.0 }
 0x30b   :  { %v381_v1 = vadd.f32 %v380_v0, %v379_v63 }
 0x30d   :  { %v382_v2 = vrot.slane %v381_v1, 4 }
 0x30f   :  { %v383_v3 = vadd.f32 %v382_v2, %v381_v1 }
 0x311   :  { %v384_v7 = vrot.slane %v383_v3, 2 }
 0x313   :  { %v385_v8 = vadd.f32 %v384_v7, %v383_v3 }
 0x315   :  { %v386_v9 = vrot.slane %v385_v8, 1 }
 0x317   :  { %v387_v10 = vadd.f32 %v386_v9, %v385_v8 }
 0x319   :  { %v392_v5 = vadd.f32 %v390_v4, %v387_v10 }
 0x31b   :  { %v397_v11 = vmul.f32 %v395_v6, %v392_v5 }
 0x31d   :  { %399 = vst.msk [vmem:[#allocation7] sm:$0x1] %vm398_vm4, %v397_v11 }
 0x31e   :  { %542 = shalt.err (!%p539_p0)
}
 0x31f   :  { %409 = dma.vmem_to_hbm [thread:$0]  %s407_s23, 16, %s648_s2, [#allocation4]  }
 0x320   :  { %555 = dma.done.wait [#allocation4], 16  }
 0x321   :  { %556 = vsyncadd [#allocation4], 4294967280 }
 0x322   :  { %413 = vsyncpa [#allocation3], 1 }
 0x323   :  { %414 = vsyncpa [#allocation6], 1 }
 0x324   :  { %415 = vsyncpa [#allocation4], 1 }

</bundles_post_ra>
